<compile_context>
chip_gen: v7x
topology: tpu7x:2x2x1
jax: 0.10.0
libtpu: 0.0.40
codegen_flags: <defaults>
</compile_context>

<pallas_src>
import jax
import jax.numpy as jnp
from jax.experimental import pallas as pl
from jax.experimental.pallas import tpu as pltpu


# ----------------------------- kernel body ---------------------------------

def _squash_kernel(x_ref, o_ref):
    x = x_ref[...]
    xf = x.astype(jnp.float32)          # no-op for f32; v5e has no bf16 VALU/EUP
    x2 = xf * xf
    if jnp.dtype(o_ref.dtype).itemsize >= 4:
        # Exact divide for f32 outputs (keeps 1e-6 tolerance).
        y = x2 / (1.0 + x2)
    else:
        # Sub-32-bit outputs: EUP reciprocal (separate VLIW slot, ~free) keeps
        # the VALU off the critical path; ~2^-12 rel error << bf16 resolution.
        # x2 * rcp (not 1 - rcp) keeps NaN where x^2 overflows to inf.
        y = x2 * pl.reciprocal(1.0 + x2, approx=True)
    o_ref[...] = y.astype(o_ref.dtype)


# ----------------------------- tiling helpers -------------------------------

_SINGLE_BLOCK_BYTES = 1 * 1024 * 1024        # grid-less path (latency regime)
_MAX_TILE_BYTES = 8 * 1024 * 1024            # per-input block target
_LANE_CANDIDATES = (4096, 2048, 1024, 512, 256, 128)


def _cdiv(a: int, b: int) -> int:
    return -(-a // b)


def _round_up(a: int, m: int) -> int:
    return _cdiv(a, m) * m


def _sublane(dtype) -> int:
    # native sublane packing per dtype width: f32->8, bf16->16, 8-bit->32
    return {4: 8, 2: 16, 1: 32}.get(jnp.dtype(dtype).itemsize, 8)


def _tpu_vmem_bytes() -> int:
    try:
        return int(getattr(pltpu.get_tpu_info(), "vmem_capacity_bytes", 0))
    except Exception:
        return 0


def _tile_bytes_target() -> int:
    """Generation-aware tile size: 8 MiB, clamped so in+out x double-buffer
    (4x tile) plus scratch stays well inside physical VMEM (64 MiB on v7x)."""
    target = _MAX_TILE_BYTES
    vmem = _tpu_vmem_bytes()
    if vmem:
        target = min(target, max(1 << 20, vmem // 8))
    return target


def _pick_row_tile(rows: int, sub: int, lane: int, itemsize: int,
                   tile_bytes: int) -> int:
    """Row-tile (multiple of `sub`) for a cdiv grid with a masked last block.
    Forces >= 2 (and even, when small) steps so the pipeline overlaps DMA with
    compute and v7x's two TensorCores split the grid evenly."""
    tr_max = max(sub, (tile_bytes // (lane * itemsize)) // sub * sub)
    steps = max(2, _cdiv(rows, tr_max))
    if steps < 16 and steps % 2 == 1:
        steps += 1
    tr = max(sub, _round_up(_cdiv(rows, steps), sub))
    return min(tr, tr_max)


# ----------------------------- pallas_call wrappers --------------------------

def _single_block_call(x2d: jnp.ndarray) -> jnp.ndarray:
    """Grid-less call: whole (small) array as one VMEM block."""
    return pl.pallas_call(
        _squash_kernel,
        out_shape=jax.ShapeDtypeStruct(x2d.shape, x2d.dtype),
    )(x2d)


def _tiled_call(x2d: jnp.ndarray, tr: int) -> jnp.ndarray:
    rows, lane = x2d.shape
    dtype = x2d.dtype
    itemsize = jnp.dtype(dtype).itemsize
    n = rows * lane
    tile_vmem = tr * lane * itemsize

    # Raise the scoped VMEM limit enough for 4x tile (double-buffered in+out)
    # plus headroom, capped at ~3/4 of physical VMEM when known.
    vmem_limit = max(32 << 20, 5 * tile_vmem)
    phys = _tpu_vmem_bytes()
    if phys:
        vmem_limit = min(vmem_limit, (phys * 3) // 4)

    return pl.pallas_call(
        _squash_kernel,
        out_shape=jax.ShapeDtypeStruct((rows, lane), dtype),
        grid=(pl.cdiv(rows, tr),),
        in_specs=[pl.BlockSpec((tr, lane), lambda i: (i, 0))],
        out_specs=pl.BlockSpec((tr, lane), lambda i: (i, 0)),
        compiler_params=pltpu.CompilerParams(
            dimension_semantics=("parallel",),
            vmem_limit_bytes=int(vmem_limit)),
        cost_estimate=pl.CostEstimate(
            flops=3 * n,
            transcendentals=0 if itemsize >= 4 else n,
            bytes_accessed=2 * n * itemsize),
    )(x2d)


# ----------------------------- public entry ---------------------------------

def squash(x: jnp.ndarray) -> jnp.ndarray:
    """Elementwise x^2 / (1 + x^2) via Pallas TPU kernels."""
    orig_shape = x.shape
    dtype = x.dtype
    itemsize = jnp.dtype(dtype).itemsize
    n = x.size

    if n == 0:
        return x

    sub = _sublane(dtype)

    # ---- small path: single grid-less block (latency dominated) -------------
    if n * itemsize <= _SINGLE_BLOCK_BYTES:
        lane = None
        for cand in _LANE_CANDIDATES:               # prefer sublane-dense rows
            if n % cand == 0 and (n // cand) % sub == 0:
                lane = cand
                break
        if lane is None:
            for cand in _LANE_CANDIDATES:
                if n % cand == 0:
                    lane = cand
                    break
        if lane is not None:
            out = _single_block_call(x.reshape(n // lane, lane))
            return out.reshape(orig_shape)
        # n % 128 != 0: pad the tiny tail once -> lane/sublane-dense (m, 128)
        # slab (instead of a 1/8-sublane (1, n) slab), then slice back.
        n_pad = _round_up(n, 128)
        x2d = jnp.pad(jnp.ravel(x), (0, n_pad - n)).reshape(n_pad // 128, 128)
        out = _single_block_call(x2d)
        return out.reshape(-1)[:n].reshape(orig_shape)

    tile_bytes = _tile_bytes_target()

    # ---- lane-aligned wide-slab path: no pad, no tail copies ----------------
    # Only n % lane == 0 is required; the row count may be anything because the
    # cdiv grid masks the partial last block.
    for lane in _LANE_CANDIDATES:
        if n % lane == 0:
            rows = n // lane
            tr = _pick_row_tile(rows, sub, lane, itemsize, tile_bytes)
            out2d = _tiled_call(x.reshape(rows, lane), tr)
            return out2d.reshape(orig_shape)

    # ---- ragged path (n % 128 != 0): tiled prefix + tiny tail ---------------
    lane = 512
    n_main = (n // lane) * lane                     # > 0 (array is > 1 MiB)
    rem = n - n_main
    x_flat = jnp.ravel(x)

    rows = n_main // lane
    tr = _pick_row_tile(rows, sub, lane, itemsize, tile_bytes)
    main_out = _tiled_call(x_flat[:n_main].reshape(rows, lane), tr).reshape(-1)

    pad = _round_up(rem, 128) - rem
    tail2d = jnp.pad(x_flat[n_main:], (0, pad)).reshape(-1, 128)
    tail_out = _single_block_call(tail2d).reshape(-1)[:rem]

    # TODO(synk): the concatenate is one residual full-array copy; removing it
    # needs an in-kernel masked tail (scalar-prefetch of n) for marginal gain.
    return jnp.concatenate([main_out, tail_out]).reshape(orig_shape)


# ----------------------------- self test ------------------------------------

if __name__ == "__main__":
    key = jax.random.PRNGKey(0)
    keys = jax.random.split(key, 4)

    def ref_fn(v):
        vf = v.astype(jnp.float32)
        return (vf ** 2 / (1.0 + vf ** 2)).astype(v.dtype)

    # 1) Small NCHW input (PyTorch-module-like usage) -> single-block path.
    x_small = jax.random.normal(keys[0], (2, 4, 16, 16), dtype=jnp.float32)
    out_small = jax.block_until_ready(squash(x_small))
    assert out_small.shape == x_small.shape and out_small.dtype == x_small.dtype
    assert jnp.allclose(out_small, ref_fn(x_small), atol=1e-6, rtol=1e-6)

    # 2) Lane-aligned larger input -> tiled cdiv grid path (2 parallel steps).
    x_grid = jax.random.normal(keys[1], (4, 8, 128, 128), dtype=jnp.float32)
    out_grid = jax.block_until_ready(squash(x_grid))
    assert out_grid.shape == x_grid.shape and out_grid.dtype == x_grid.dtype
    assert jnp.allclose(out_grid, ref_fn(x_grid), atol=1e-6, rtol=1e-6)

    # 3) bf16 input -> EUP-reciprocal branch.
    x_bf16 = jax.random.normal(keys[2], (4, 8, 32, 32), dtype=jnp.bfloat16)
    out_bf16 = jax.block_until_ready(squash(x_bf16))
    assert out_bf16.shape == x_bf16.shape and out_bf16.dtype == x_bf16.dtype
    assert jnp.allclose(out_bf16.astype(jnp.float32),
                        ref_fn(x_bf16).astype(jnp.float32),
                        atol=3e-2, rtol=3e-2)

    # 4) Ragged small input (n % 128 != 0) -> padded (m, 128) single block.
    x_rag_s = jax.random.normal(keys[3], (3, 5, 7), dtype=jnp.float32)
    out_rag_s = jax.block_until_ready(squash(x_rag_s))
    assert out_rag_s.shape == x_rag_s.shape
    assert jnp.allclose(out_rag_s, ref_fn(x_rag_s), atol=1e-6, rtol=1e-6)

    # 5) Ragged large input -> tiled prefix + tiny tail path.
    x_rag_l = jax.random.normal(jax.random.PRNGKey(7), (300001,),
                                dtype=jnp.float32)
    out_rag_l = jax.block_until_ready(squash(x_rag_l))
    assert out_rag_l.shape == x_rag_l.shape
    assert jnp.allclose(out_rag_l, ref_fn(x_rag_l), atol=1e-6, rtol=1e-6)

    print("KERNEL_OK")
</pallas_src>

<mosaic_0001>
module attributes {stable_mosaic.version = 11 : i64} {
  func.func @_squash_kernel(%arg0: memref<8x256xf32, #tpu.memory_space<vmem>>, %arg1: memref<8x256xf32, #tpu.memory_space<vmem>>) attributes {dimension_semantics = [], scalar_prefetch = 0 : i64, scratch_operands = 0 : i64, tpu.core_type = #tpu.core_type<tc>} {
    %c0 = arith.constant 0 : index
    %c0_0 = arith.constant 0 : index
    %0 = vector.load %arg0[%c0, %c0_0] : memref<8x256xf32, #tpu.memory_space<vmem>>, vector<8x256xf32>
    %1 = arith.mulf %0, %0 : vector<8x256xf32>
    %cst = arith.constant 1.000000e+00 : f32
    %2 = vector.broadcast %cst : f32 to vector<8x256xf32>
    %3 = arith.addf %2, %1 : vector<8x256xf32>
    %4 = arith.divf %1, %3 : vector<8x256xf32>
    %c0_1 = arith.constant 0 : index
    %c0_2 = arith.constant 0 : index
    %5 = vector.load %arg1[%c0_1, %c0_2] : memref<8x256xf32, #tpu.memory_space<vmem>>, vector<8x256xf32>
    tpu.vector_store %arg1[%c0_1, %c0_2], %4 {strides = array<i32>} : memref<8x256xf32, #tpu.memory_space<vmem>>, vector<8x256xf32>,
    return
  }
}

</mosaic_0001>

<bundles_post_ra>
// kernel: tpu_custom_call.1
= control target key start
LH: loop header
LB: loop body
LE: loop exit
PB: predicated region body
PF: predicated region fallthrough
CT: control target
= control target key end

     0   :  { %6 = vsyncpa [#allocation3], 0  ;;  %s138_s0 = inlined_call_operand.hbm [shape: f32[8,256], index: 0, kind: input, shape index: {}]   ;;  %s139_s1 = inlined_call_operand.hbm [shape: f32[8,256], index: 1, kind: output, shape index: {}]  }
   0x1   :  { %7 = vsyncpa [#allocation4], 0  ;;  %s102_s6 = smov [#allocation2]   ;;  %s54_s10 = scalar_lea.hbm %s138_s0, 256 }
   0x2   :  { %s14_s7 = sshll.u32 %s102_s6, 4  ;;  %p55_p0 = scmp.ne.s32.totalorder %s138_s0, %s54_s10  ;;  %s15_s7 = int_to_ptr.vmem [resolvable:$true] %s14_s7 }
   0x3   :  { %p58_p1 = scmp.lt.u32.totalorder %s54_s10, %s138_s0 }
   0x5   :  { %p60_p2 = pnand %p58_p1, %p55_p0 }
   0x7   :  { %63 = shalt.err (!%p60_p2)
}
   0x8   :  { %s64_s15 = scalar_lea.vmem %s15_s7, 256  ;;  %p69_p4 = scmp.lt.s32.totalorder %s15_s7, %s15_s7 }
   0x9   :  { %p65_p3 = scmp.ne.s32.totalorder %s15_s7, %s64_s15  ;;  %p70_p5 = scmp.lt.s32.totalorder %s64_s15, %s64_s15 }
   0xb   :  { %p71_p6 = por %p70_p5, %p69_p4 }
   0xd   :  { %p72_p7 = pnand %p71_p6, %p65_p3 }
   0xf   :  { %75 = shalt.err (!%p72_p7)
}
  0x10   :  { %17 = dma.hbm_to_vmem [thread:$0]  %s138_s0, 256, %s15_s7, [#allocation3]  }
  0x11   :  { %98 = dma.done.wait [#allocation3], 256  }
  0x12   :  { %99 = vsyncadd [#allocation3], 4294967040  ;;  %v21_v0 = vld [vmem:[#allocation2] sm:$0xff]  ;;  %v22_v1 = vld [vmem:[#allocation2 + $0x8] sm:$0xff]  ;;  %s103_s18 = smov [#allocation5]  }
  0x13   :  { %v23_v2 = vmul.f32 %v21_v0, %v21_v0  ;;  %v24_v3 = vmul.f32 %v22_v1, %v22_v1  ;;  %s39_s19 = sshll.u32 %s103_s18, 4  ;;  %s40_s19 = int_to_ptr.vmem [resolvable:$true] %s39_s19 }
  0x14   :  { %s76_s0 = scalar_lea.vmem %s40_s19, 256  ;;  %p81_p9 = scmp.lt.s32.totalorder %s40_s19, %s40_s19 }
  0x15   :  { %v25_v4 = vadd.f32 1.0, %v23_v2  ;;  %v26_v5 = vadd.f32 1.0, %v24_v3  ;;  %p77_p8 = scmp.ne.s32.totalorder %s40_s19, %s76_s0  ;;  %p82_p10 = scmp.lt.s32.totalorder %s76_s0, %s76_s0 }
  0x17   :  { %50 = vrcp.f32 %v25_v4  ;;  %p83_p11 = por %p82_p10, %p81_p9 }
  0x18   :  { %52 = vrcp.f32 %v26_v5 }
  0x19   :  { %p84_p12 = pnand %p83_p11, %p77_p8 }
  0x21   :  { %v51_v6 = vpop.eup %50 }
  0x22   :  { %v53_v7 = vpop.eup %52  ;;  %v28_v8 = vmul.f32 %v51_v6, %v23_v2 }
  0x23   :  { %v30_v9 = vmul.f32 %v53_v7, %v24_v3 }
  0x24   :  { %31 = vst [vmem:[#allocation5] sm:$0xff] %v28_v8 }
  0x25   :  { %32 = vst [vmem:[#allocation5 + $0x8] sm:$0xff] %v30_v9 }
  0x26   :  { %87 = shalt.err (!%p84_p12)
}
  0x27   :  { %s88_s22 = scalar_lea.hbm %s139_s1, 256 }
  0x28   :  { %p89_p13 = scmp.ne.s32.totalorder %s139_s1, %s88_s22  ;;  %p92_p0 = scmp.lt.u32.totalorder %s88_s22, %s139_s1 }
  0x2a   :  { %p94_p1 = pnand %p92_p0, %p89_p13 }
  0x2c   :  { %97 = shalt.err (!%p94_p1)
}
  0x2d   :  { %42 = dma.vmem_to_hbm [thread:$0]  %s40_s19, 256, %s139_s1, [#allocation4]  }
  0x2e   :  { %100 = dma.done.wait [#allocation4], 256  }
  0x2f   :  { %101 = vsyncadd [#allocation4], 4294967040 }
  0x30   :  { %46 = vsyncpa [#allocation3], 1 }
  0x31   :  { %47 = vsyncpa [#allocation4], 1 }

</bundles_post_ra>
